<compile_context>
chip_gen: v7x
topology: tpu7x:2x2x1
jax: 0.10.0
libtpu: 0.0.40
codegen_flags: <defaults>
</compile_context>

<pallas_src>
import math

import jax
import jax.numpy as jnp
from jax.experimental import pallas as pl
from jax.experimental.pallas import tpu as pltpu


_LANES = 128
_SAMPLES_PER_ROW = _LANES // 4        # 32 samples per 128-lane row
_MAX_TILE_M = 8192                    # rows -> 4 MiB f32 input per pipeline buffer
_MIN_PALLAS_SAMPLES = 2048            # below this a fused XLA reduce wins outright


def _garch_kernel(x_ref, b_ref, o_ref):
    """One grid step of the GJR-GARCH linear layer.

    x_ref: (TILE_M, 128) f32 -- 32 samples per row, features interleaved on lanes.
    b_ref: (128, 32)     f32 -- sparse reduce + de-interleave matrix.
    o_ref: (TILE_M, 32)  f32 -- one output per sample, lane/sublane-dense.
    """
    o_ref[...] = jnp.dot(
        x_ref[...],
        b_ref[...],
        precision=jax.lax.Precision.HIGHEST,
        preferred_element_type=jnp.float32,
    )


def _round_up(x, m):
    return ((x + m - 1) // m) * m


def garch_nn_forward(x, weight):
    """Pallas forward of GarchNN: y = (x @ weight.T).squeeze(-1).

    x:      (..., 4) float32 -- [1, eps^2, eps^2 * I(eps<0), sigma^2]
    weight: (1, 4) or (4,) float32 -- [omega, alpha, gamma, beta]
    returns x.shape[:-1] float32
    """
    if x.shape[-1] != 4:
        raise ValueError("GarchNN expects 4 input features")

    lead_shape = x.shape[:-1]
    n = math.prod(lead_shape) if lead_shape else 1

    w = jnp.asarray(weight, jnp.float32).reshape(4)
    xf = jnp.asarray(x, jnp.float32)

    if n == 0:
        return jnp.zeros(lead_shape, jnp.float32)

    if n < _MIN_PALLAS_SAMPLES or n % _SAMPLES_PER_ROW != 0:
        # Small or ragged sizes: a fused XLA multiply+reduce is a single pass
        # over the data (16n B read, 4n B write) with no launch or re-layout
        # overhead -- cheaper than any kernel here.
        return jnp.sum(xf * w, axis=-1)

    m = n // _SAMPLES_PER_ROW
    # Free, contiguous reshape of the row-major (..., 4) buffer: no transpose,
    # no pad, no extra HBM pass.
    x2 = xf.reshape(m, _LANES)

    # Sparse reduce + de-interleave matrix: B[k, j] = w[k % 4] if k // 4 == j.
    # (x2 @ B)[r, j] = sum_f x2[r, 4j + f] * w[f] = y for sample 32r + j.
    k = jnp.arange(_LANES)
    j = jnp.arange(_SAMPLES_PER_ROW)
    b = jnp.where((k[:, None] // 4) == j[None, :], w[k % 4][:, None], 0.0)
    b = b.astype(jnp.float32)

    # Tile choice: cap at 4 MiB of input per buffer (double-buffered total
    # ~10 MiB fits every generation's scoped-VMEM default) and force >= 2 grid
    # steps so the "parallel" axis can be split across v7x's two TensorCores.
    num_tiles = max(2, -(-m // _MAX_TILE_M))
    tile_m = min(_MAX_TILE_M, _round_up(-(-m // num_tiles), 8))
    grid = (-(-m // tile_m),)

    out = pl.pallas_call(
        _garch_kernel,
        out_shape=jax.ShapeDtypeStruct((m, _SAMPLES_PER_ROW), jnp.float32),
        grid=grid,
        in_specs=[
            # x: contiguous, lane+sublane dense (TILE_M, 128) tiles, pipelined.
            pl.BlockSpec((tile_m, _LANES), lambda i: (i, 0)),
            # B: 16 KiB constant, same block every step -> fetched once.
            pl.BlockSpec((_LANES, _SAMPLES_PER_ROW), lambda i: (0, 0)),
        ],
        # Output: contiguous, dense (TILE_M, 32) tiles of the (M, 32) result.
        out_specs=pl.BlockSpec((tile_m, _SAMPLES_PER_ROW), lambda i: (i, 0)),
        compiler_params=pltpu.CompilerParams(
            dimension_semantics=("parallel",),   # independent row tiles
        ),
    )(x2, b)

    # (M, 32) row-major is exactly the flat (n,) output: free reshape.
    return out.reshape(lead_shape)


if __name__ == "__main__":
    # Deterministic parameters, matching GarchNN defaults.
    init_omega, init_alpha, init_gamma, init_beta = 0.05, 0.1, 0.15, 0.7
    weight = jnp.array([[init_omega, init_alpha, init_gamma, init_beta]],
                       dtype=jnp.float32)          # nn.Linear(4, 1).weight shape

    key = jax.random.PRNGKey(0)
    # Small batch of GARCH feature rows; n = 16*300 = 4800 samples -> Pallas
    # path with a 2-step grid (exercises the ragged last block as well).
    x = jax.random.uniform(key, (16, 300, 4), dtype=jnp.float32)

    fwd = jax.jit(garch_nn_forward)
    y = fwd(x, weight)
    jax.block_until_ready(y)

    w1d = weight.reshape(4)
    y_ref = jnp.sum(x * w1d, axis=-1)              # exact f32 reference of the PyTorch forward
    assert y.shape == (16, 300)
    max_err = float(jnp.max(jnp.abs(y - y_ref)))
    assert jnp.allclose(y, y_ref, rtol=1e-4, atol=1e-4), f"max_err={max_err}"

    # Tiny / ragged sizes take the fused-XLA fast path; sanity-check it too.
    x_small = jax.random.uniform(jax.random.PRNGKey(1), (5, 7, 4), dtype=jnp.float32)
    y_small = fwd(x_small, weight)
    jax.block_until_ready(y_small)
    assert y_small.shape == (5, 7)
    assert jnp.allclose(y_small, jnp.sum(x_small * w1d, axis=-1), rtol=1e-5, atol=1e-5)

    print("KERNEL_OK")
</pallas_src>

<mosaic_0001>
module attributes {stable_mosaic.version = 11 : i64} {
  func.func @_garch_kernel(%arg0: i32, %arg1: memref<80x128xf32, #tpu.memory_space<vmem>>, %arg2: memref<128x32xf32, #tpu.memory_space<vmem>>, %arg3: memref<80x32xf32, #tpu.memory_space<vmem>>) attributes {dimension_semantics = [#tpu.dimension_semantics<parallel>], iteration_bounds = array<i64: 2>, scalar_prefetch = 0 : i64, scratch_operands = 0 : i64, tpu.core_type = #tpu.core_type<tc>, window_params = [{transform_indices = @transform_0, window_bounds = array<i64: 80, 128>}, {pipeline_mode = #tpu.pipeline_mode<synchronous>, transform_indices = @transform_1, window_bounds = array<i64: 128, 32>}, {transform_indices = @transform_2, window_bounds = array<i64: 80, 32>}]} {
    %c0 = arith.constant 0 : index
    %c0_0 = arith.constant 0 : index
    %0 = vector.load %arg1[%c0, %c0_0] : memref<80x128xf32, #tpu.memory_space<vmem>>, vector<80x128xf32>
    %c0_1 = arith.constant 0 : index
    %c0_2 = arith.constant 0 : index
    %1 = vector.load %arg2[%c0_1, %c0_2] : memref<128x32xf32, #tpu.memory_space<vmem>>, vector<128x32xf32>
    %cst = arith.constant dense<0.000000e+00> : vector<80x32xf32>
    %2 = tpu.matmul %0, %1, %cst {dimension_numbers = #tpu.dot_dimension_numbers<[1], [0], [0], [1], [0, 0, 1, 1], [], []>, precision = #tpu.contract_precision<fp32>} : vector<80x128xf32>, vector<128x32xf32>, vector<80x32xf32> -> vector<80x32xf32>
    %c0_3 = arith.constant 0 : index
    %c0_4 = arith.constant 0 : index
    %3 = vector.load %arg3[%c0_3, %c0_4] : memref<80x32xf32, #tpu.memory_space<vmem>>, vector<80x32xf32>
    tpu.vector_store %arg3[%c0_3, %c0_4], %2 {strides = array<i32>} : memref<80x32xf32, #tpu.memory_space<vmem>>, vector<80x32xf32>,
    return
  }
  func.func @transform_0(%arg0: i32) -> (i32, i32) {
    %c0_i32 = arith.constant 0 : i32
    %c0_i32_0 = arith.constant 0 : i32
    return %arg0, %c0_i32 : i32, i32
  }
  func.func @transform_1(%arg0: i32) -> (i32, i32) {
    %c0_i32 = arith.constant 0 : i32
    %c0_i32_0 = arith.constant 0 : i32
    %c0_i32_1 = arith.constant 0 : i32
    return %c0_i32, %c0_i32_0 : i32, i32
  }
  func.func @transform_2(%arg0: i32) -> (i32, i32) {
    %c0_i32 = arith.constant 0 : i32
    %c0_i32_0 = arith.constant 0 : i32
    return %arg0, %c0_i32 : i32, i32
  }
}

</mosaic_0001>

<bundles_post_ra>
// kernel: garch_nn_forward.1
= control target key start
LH: loop header
LB: loop body
LE: loop exit
PB: predicated region body
PF: predicated region fallthrough
CT: control target
= control target key end

     0   :  { %s2378_s9 = smov 0   ;;  %s2380_s10 = smov 0   ;;  %s2963_s0 = inlined_call_operand.vmem [shape: f32[150,128], index: 0, kind: input, shape index: {}]   ;;  %s2964_s1 = inlined_call_operand.vmem [shape: f32[128,32], index: 1, kind: input, shape index: {}]   ;;  %s2965_s2 = inlined_call_operand.vmem [shape: f32[150,32], index: 2, kind: output, shape index: {}]  }
   0x1   :  { %s2382_s11 = smov 0  }
   0x2 LB: > { %s2391_s12 = sadd.s32 4294967295, %s2329_s11   ;;  %s2393_s13 = sadd.s32 1, %s2329_s11   ;;  %s2329_s11 = sphi %s2382_s11, %s3035_s11   ;;  %s2325_s10 = sphi %s2380_s10, %s3034_s10   ;;  %s2321_s9 = sphi %s2378_s9, %s3033_s9  }
   0x3   : > { %s63_s14 = ssub.s32 %s2329_s11, %s2393_s13  ;;  %s66_s15 = sadd.s32 1, %s2325_s10 }
   0x4   : > { %p64_p0 = scmp.eq.s32.totalorder %s63_s14, 0  ;;  %p76_p1 = scmp.ne.s32.totalorder %s2325_s10, %s2321_s9 }
   0x5   : > { %p77_p2 = scmp.eq.s32.totalorder %s2391_s12, 1  ;;  %p1486_p3 = scmp.ge.s32.totalorder %s2329_s11, 1 }
   0x6   : > { %s2401_s16 = scalar_select %p64_p0, %s2325_s10, %s66_s15  }
   0x7   : > { %p2403_p4 = por %p77_p2, %p76_p1  ;;  %p121_p5 = scmp.lt.s32.totalorder %s2329_s11, 3 }
   0x9   : > { %p122_p6 = pnand %p1486_p3, %p121_p5 }
   0xb   : > { %125 = sbr.rel (%p122_p6) target bundleno = 413 (0x19d), region = 28 }
  0x12   : > { %v175_v0 = vld [vmem:[%s2964_s1] sm:$0xff]  ;;  %v176_v1 = vld [vmem:[%s2964_s1 + $0x8] sm:$0xff]  ;;  %v177_v2 = vld [vmem:[%s2964_s1 + $0x10] sm:$0xff]  ;;  %s2417_s24 = smul.u32 10, %s2391_s12  ;;  %vm1219_vm0 = vcmask 261120  }
  0x13   : > { %v192_v3 = vand.u32 4294901760, %v175_v0  ;;  %v195_v4 = vand.u32 4294901760, %v176_v1  ;;  %v178_v5 = vld [vmem:[%s2964_s1 + $0x18] sm:$0xff]  ;;  %v198_v6 = vand.u32 4294901760, %v177_v2  ;;  %v2425_v7 = vld [vmem:[%s2964_s1 + $0x20] sm:$0xff]  ;;  %v2430_v8 = vld [vmem:[%s2964_s1 + $0x28] sm:$0xff] }
  0x14   : > { %v201_v9 = vand.u32 4294901760, %v178_v5  ;;  %v204_v11 = vand.u32 4294901760, %v2425_v7  ;;  %v207_v12 = vand.u32 4294901760, %v2430_v8  ;;  %v2441_v14 = vld [vmem:[%s2964_s1 + $0x30] sm:$0xff]  ;;  %v2446_v15 = vld [vmem:[%s2964_s1 + $0x38] sm:$0xff]  ;;  %p151_p7 = scmp.lt.s32.totalorder %s2417_s24, 18 }
  0x15   : > { %v2432_v10 = vpack.c.bf16 %v195_v4, %v192_v3  ;;  %v210_v17 = vand.u32 4294901760, %v2441_v14  ;;  %v213_v18 = vand.u32 4294901760, %v2446_v15  ;;  %v2467_v19 = vld [vmem:[%s2964_s1 + $0x40] sm:$0xff]  ;;  %v2472_v20 = vld [vmem:[%s2964_s1 + $0x48] sm:$0xff]  ;;  %v2495_v25 = vld [vmem:[%s2964_s1 + $0x50] sm:$0xff]  ;;  %v2507_v29 = vsub.f32 %v175_v0, %v192_v3  ;;  %s1500_s14 = smul.u32 (%p2403_p4), 80, %s2391_s12 }
  0x16   : > { %v2436_v13 = vpack.c.bf16 %v201_v9, %v198_v6  ;;  %s152_s7 = scalar_select %p151_p7, %s2417_s24, 18  ;;  %v2460_v16 = vpack.c.bf16 %v207_v12, %v204_v11  ;;  %v216_v23 = vand.u32 4294901760, %v2467_v19  ;;  %v219_v24 = vand.u32 4294901760, %v2472_v20  ;;  %v2500_v26 = vld [vmem:[%s2964_s1 + $0x58] sm:$0xff]  ;;  %v2519_v34 = vld [vmem:[%s2964_s1 + $0x60] sm:$0xff]  ;;  %v2536_v38 = vld [vmem:[%s2964_s1 + $0x68] sm:$0xff] }
  0x17   : > { %1940 = vmatprep.subr.bf16.mxu1 %v2432_v10  ;;  %2036 = vmatprep.subr.bf16.mxu0 %v2432_v10  ;;  %v2488_v22 = vpack.c.bf16 %v213_v18, %v210_v17  ;;  %v2509_v30 = vsub.f32 %v176_v1, %v195_v4  ;;  %v222_v32 = vand.u32 4294901760, %v2495_v25  ;;  %v225_v33 = vand.u32 4294901760, %v2500_v26  ;;  %v2546_v43 = vld [vmem:[%s2964_s1 + $0x70] sm:$0xff]  ;;  %v2551_v44 = vld [vmem:[%s2964_s1 + $0x78] sm:$0xff]  ;;  %s2911_s19 = scalar_lea.vmem (%p2403_p4), %s2965_s2, %s1500_s14  }
  0x18   : > { %1942 = vmatpush3.bf16.msra.mxu1 %v2432_v10  ;;  %2038 = vmatpush3.bf16.msra.mxu0 %v2432_v10  ;;  %s1487_s18 = sshll.u32 %s152_s7, 3  ;;  %v2521_v35 = vsub.f32 %v177_v2, %v198_v6  ;;  %v2523_v36 = vsub.f32 %v178_v5, %v201_v9  ;;  %v2531_v37 = vpack.c.bf16 %v219_v24, %v216_v23  ;;  %v2969_v42 = vand.u32 4294901760, %v2519_v34  ;;  %s143_s7 = sand.u32 1, %s2321_s9  }
  0x19   : > { %1944 = vmatprep.subr.bf16.mxu1 %v2436_v13  ;;  %2040 = vmatprep.subr.bf16.mxu0 %v2436_v13  ;;  %s2477_s21 = scalar_lea.vmem %s2963_s0, %s1487_s18  ;;  %v375_v46 = vand.u32 4294901760, %v2507_v29  ;;  %v382_v47 = vand.u32 4294901760, %v2509_v30  ;;  %v2562_v48 = vpack.c.bf16 %v225_v33, %v222_v32  ;;  %v2968_v49 = vand.u32 4294901760, %v2536_v38  ;;  %s2181_s8 = smul.u32 80, %s143_s7 }
  0x1a   : > { %v165_v21 = vld [vmem:[%s2477_s21] sm:$0xff]  ;;  %v166_v31 = vld [vmem:[%s2477_s21 + $0x8] sm:$0xff]  ;;  %2992 = vst [vmem:[#allocation4_spill] sm:$0xff] %v2531_v37  ;;  %v167_v41 = vld [vmem:[%s2477_s21 + $0x10] sm:$0xff]  ;;  %v389_v50 = vand.u32 4294901760, %v2521_v35  ;;  %v396_v51 = vand.u32 4294901760, %v2523_v36  ;;  %v2573_v54 = vsub.f32 %v2425_v7, %v204_v11  ;;  %v2578_v55 = vsub.f32 %v2430_v8, %v207_v12 }
  0x1b   : > { %v2502_v27 = vand.u32 4294901760, %v165_v21  ;;  %v2539_v40 = vand.u32 4294901760, %v166_v31  ;;  %2993 = vst [vmem:[#allocation5_spill] sm:$0xff] %v2562_v48  ;;  %v168_v52 = vld [vmem:[%s2477_s21 + $0x18] sm:$0xff]  ;;  %v2580_v56 = vand.u32 4294901760, %v167_v41  ;;  %v2967_v57 = vand.u32 4294901760, %v2546_v43 }
  0x1c   : > { %1946 = vmatpush3.bf16.msra.mxu1 %v2436_v13  ;;  %2042 = vmatpush3.bf16.msra.mxu0 %v2436_v13  ;;  %v2966_v58 = vand.u32 4294901760, %v2551_v44  ;;  %v376_v60 = vsub.f32 %v2507_v29, %v375_v46  ;;  %v383_v61 = vsub.f32 %v2509_v30, %v382_v47  ;;  %v2589_v62 = vand.u32 4294901760, %v168_v52  ;;  %v169_v63 = vld [vmem:[%s2477_s21 + $0x20] sm:$0xff]  ;;  %v170_v7 = vld [vmem:[%s2477_s21 + $0x28] sm:$0xff]  ;;  %s2882_s11 = scalar_lea.vmem [#allocation2], %s2181_s8   ;;  %s1238_s9 = ssub.s32 (%p2403_p4), 19, %s2417_s24 }
  0x1d   : > { %1948 = vmatprep.subr.bf16.mxu1 %v2460_v16  ;;  %2044 = vmatprep.subr.bf16.mxu0 %v2460_v16  ;;  %v2505_v28 = vsub.f32 %v165_v21, %v2502_v27  ;;  %v2585_v59 = vsub.f32 %v166_v31, %v2539_v40  ;;  %v2598_v0 = vpack.c.bf16 %v2968_v49, %v2969_v42  ;;  %v403_v3 = vand.u32 4294901760, %v2573_v54  ;;  %v171_v31 = vld [vmem:[%s2477_s21 + $0x30] sm:$0xff]  ;;  %p1239_p8 = scmp.lt.s32.totalorder (%p2403_p4), %s1238_s9, 10 }
  0x1e   : > { %v390_v1 = vsub.f32 %v2521_v35, %v389_v50  ;;  %v397_v2 = vsub.f32 %v2523_v36, %v396_v51  ;;  %v2970_v4 = vand.u32 4294901760, %v2578_v55  ;;  %v2609_v5 = vsub.f32 %v2441_v14, %v210_v17 }
  0x1f   : > { %2991 = vst [vmem:[#allocation3_spill] sm:$0xff] %v2505_v28  ;;  %v274_v39 = vand.u32 4294901760, %v2505_v28  ;;  %2994 = vst [vmem:[#allocation6_spill] sm:$0xff] %v2585_v59  ;;  %v2612_v6 = vsub.f32 %v167_v41, %v2580_v56  ;;  %v2619_v8 = vpack.c.bf16 %v2966_v58, %v2967_v57  ;;  %v2971_v9 = vand.u32 4294901760, %v2585_v59 }
  0x20   : > { %1950 = vmatpush3.bf16.msra.mxu1 %v2460_v16  ;;  %2046 = vmatpush3.bf16.msra.mxu0 %v2460_v16  ;;  %2995 = vst [vmem:[#allocation7_spill] sm:$0xff] %v2598_v0  ;;  %v2622_v11 = vand.u32 4294901760, %v169_v63  ;;  %v377_v12 = vand.u32 4294901760, %v376_v60  ;;  %v384_v21 = vand.u32 4294901760, %v383_v61  ;;  %v2627_v14 = vsub.f32 %v2446_v15, %v213_v18 }
  0x21   : > { %1952 = vmatprep.subr.bf16.mxu1 %v2488_v22  ;;  %2048 = vmatprep.subr.bf16.mxu0 %v2488_v22  ;;  %v275_v45 = vsub.f32 %v2505_v28, %v274_v39  ;;  %2996 = vst [vmem:[#allocation8_spill] sm:$0xff] %v2619_v8  ;;  %v2630_v17 = vsub.f32 %v168_v52, %v2589_v62  ;;  %v391_v41 = vand.u32 4294901760, %v390_v1  ;;  %v172_v52 = vld [vmem:[%s2477_s21 + $0x38] sm:$0xff] }
  0x22   : > { %1830 = vmatprep.mubr.f32.mxu0 %v274_v39  ;;  %v2635_v39 = vpack.c.bf16 %v382_v47, %v375_v46  ;;  %v404_v15 = vsub.f32 %v2573_v54, %v403_v3  ;;  %v411_v18 = vsub.f32 %v2578_v55, %v2970_v4  ;;  %v2972_v46 = vand.u32 4294901760, %v2609_v5  ;;  %v173_v4 = vld [vmem:[%s2477_s21 + $0x40] sm:$0xff] }
  0x23   : > { %v276_v53 = vand.u32 4294901760, %v275_v45  ;;  %v398_v45 = vand.u32 4294901760, %v397_v2  ;;  %v2973_v47 = vand.u32 4294901760, %v2612_v6  ;;  %v285_v60 = vsub.f32 %v2585_v59, %v2971_v9 }
  0x24   : > { %1954 = vmatpush3.bf16.msra.mxu1 %v2488_v22  ;;  %2050 = vmatpush3.bf16.msra.mxu0 %v2488_v22  ;;  %v2653_v61 = vpack.c.bf16 %v396_v51, %v389_v50  ;;  %v2656_v1 = vsub.f32 %v169_v63, %v2622_v11  ;;  %v2658_v2 = vand.u32 4294901760, %v171_v31  ;;  %v1971_v58 = vpack.c.bf16 %v384_v21, %v377_v12 }
  0x25   : > { %1956 = vmatprep.subr.bf16.mxu1 %v2531_v37  ;;  %2052 = vmatprep.subr.bf16.mxu0 %v2531_v37  ;;  %v424_v57 = vand.u32 4294901760, %v2627_v14  ;;  %v2974_v49 = vand.u32 4294901760, %v2630_v17  ;;  %v2668_v50 = vpack.c.bf16 %v398_v45, %v391_v41  ;;  %v2673_v51 = vsub.f32 %v2467_v19, %v216_v23 }
  0x26   : > { %1689 = vmatprep.mubr.f32.mxu1 %v276_v53  ;;  %v2637_v53 = vand.u32 4294901760, %v170_v7  ;;  %2997 = vst [vmem:[#allocation9_spill] sm:$0xff] %v2656_v1  ;;  %v2678_v63 = vsub.f32 %v2472_v20, %v219_v24  ;;  %v405_v12 = vand.u32 4294901760, %v404_v15  ;;  %v412_v21 = vand.u32 4294901760, %v411_v18 }
  0x27   : > { %v418_v41 = vsub.f32 %v2609_v5, %v2972_v46  ;;  %v295_v19 = vsub.f32 %v2612_v6, %v2973_v47  ;;  %v286_v23 = vand.u32 4294901760, %v285_v60  ;;  %v2692_v24 = vsub.f32 %v171_v31, %v2658_v2  ;;  %v174_v47 = vld [vmem:[%s2477_s21 + $0x48] sm:$0xff] }
  0x28   : > { %1958 = vmatpush3.bf16.msra.mxu1 %v2531_v37  ;;  %2054 = vmatpush3.bf16.msra.mxu0 %v2531_v37  ;;  %v2663_v42 = vsub.f32 %v170_v7, %v2637_v53  ;;  %v2680_v7 = vand.u32 4294901760, %v172_v52  ;;  %v2694_v45 = vand.u32 4294901760, %v173_v4  ;;  %v425_v9 = vsub.f32 %v2627_v14, %v424_v57 }
  0x29   : > { %1960 = vmatprep.subr.bf16.mxu1 %v2562_v48  ;;  %2056 = vmatprep.subr.bf16.mxu0 %v2562_v48  ;;  %v305_v15 = vsub.f32 %v2630_v17, %v2974_v49  ;;  %v2712_v20 = vsub.f32 %v2495_v25, %v222_v32  ;;  %v2717_v49 = vsub.f32 %v2500_v26, %v225_v33  ;;  %v3000_v31 = vand.u32 4294901760, %v2578_v55 }
  0x2a   : > { %2998 = vst [vmem:[#allocation10_spill] sm:$0xff] %v2694_v45  ;;  %v2702_v46 = vsub.f32 %v172_v52, %v2680_v7  ;;  %v1979_v52 = vpack.c.bf16 %v412_v21, %v405_v12  ;;  %v419_v60 = vand.u32 4294901760, %v418_v41  ;;  %v2729_v26 = vsub.f32 %v173_v4, %v2694_v45 }
  0x2b   : > { %v2075_v18 = vpack.c.bf16 %v3000_v31, %v403_v3  ;;  %v2731_v33 = vand.u32 4294901760, %v174_v47  ;;  %v3002_v12 = vand.u32 4294901760, %v2585_v59  ;;  %v426_v21 = vand.u32 4294901760, %v425_v9 }
  0x2c   : > { %1962 = vmatpush3.bf16.msra.mxu1 %v2562_v48  ;;  %2058 = vmatpush3.bf16.msra.mxu0 %v2562_v48  ;;  %2999 = vst [vmem:[#allocation11_spill] sm:$0xff] %v2702_v46  ;;  %v306_v28 = vand.u32 4294901760, %v305_v15  ;;  %v3003_v3 = vand.u32 4294901760, %v2663_v42  ;;  %v445_v9 = vand.u32 4294901760, %v2712_v20  ;;  %v452_v15 = vand.u32 4294901760, %v2717_v49 }
  0x2d   : > { %1964 = vmatprep.subr.bf16.mxu1 %v2598_v0  ;;  %2060 = vmatprep.subr.bf16.mxu0 %v2598_v0  ;;  %v3010_v59 = vand.u32 4294901760, %v2612_v6  ;;  %v3011_v45 = vand.u32 4294901760, %v2692_v24  ;;  %v1983_v37 = vpack.c.bf16 %v426_v21, %v419_v60  ;;  %v3013_v21 = vand.u32 4294901760, %v2546_v43 }
  0x2e   : > { %v325_v41 = vsub.f32 %v2663_v42, %v3003_v3 }
  0x30   : > { %1966 = vmatpush3.bf16.msra.mxu1 %v2598_v0  ;;  %2062 = vmatpush3.bf16.msra.mxu0 %v2598_v0  ;;  %v3001_v0 = vand.u32 4294901760, %v2656_v1 }
  0x31   : > { %1968 = vmatprep.subr.bf16.mxu1 %v2619_v8  ;;  %2064 = vmatprep.subr.bf16.mxu0 %v2619_v8 }
  0x32   : > { %v315_v25 = vsub.f32 %v2656_v1, %v3001_v0  ;;  %v3004_v0 = vand.u32 4294901760, %v2673_v51 }
  0x34   : > { %1970 = vmatpush3.bf16.msra.mxu1 %v2619_v8  ;;  %2066 = vmatpush3.bf16.msra.mxu0 %v2619_v8  ;;  %v296_v8 = vand.u32 4294901760, %v295_v19  ;;  %v344_v19 = vand.u32 4294901760, %v2702_v46  ;;  %v432_v4 = vsub.f32 %v2673_v51, %v3004_v0  ;;  %v2761_v0 = vsub.f32 %v174_v47, %v2731_v33 }
  0x35   : > { %1972 = vmatprep.subr.bf16.mxu1 %v1971_v58  ;;  %2068 = vmatprep.subr.bf16.mxu0 %v2635_v39  ;;  %v316_v48 = vand.u32 4294901760, %v315_v25  ;;  %v326_v47 = vand.u32 4294901760, %v325_v41  ;;  %v453_v25 = vsub.f32 %v2717_v49, %v452_v15  ;;  %v2784_v41 = vsub.f32 %v2546_v43, %v3013_v21 }
  0x36   : > { %3008 = vst [vmem:[#allocation12_spill] sm:$0xff] %v2761_v0 }
  0x37   : > { %1690 = vmatmul.mubr.f32.vlgmr.msra.gmra.mrb[0].mxu1 %v286_v23  ;;  %1831 = vmatmul.mubr.f32.vlgmr.msra.gmra.mrb[0].mxu0 %v3002_v12  ;;  %v3005_v23 = vand.u32 4294901760, %v2678_v63  ;;  %v3007_v12 = vand.u32 4294901760, %v2536_v38 }
  0x38   : > { %1974 = vmatpush3.bf16.msra.mxu1 %v1971_v58  ;;  %2070 = vmatpush3.bf16.msra.mxu0 %v2635_v39  ;;  %v3006_v58 = vand.u32 4294901760, %v2519_v34 }
  0x39   : > { %v439_v31 = vsub.f32 %v2678_v63, %v3005_v23  ;;  %1976 = vmatprep.subr.bf16.mxu1 %v2668_v50  ;;  %2072 = vmatprep.subr.bf16.mxu0 %v2653_v61  ;;  %v2758_v3 = vsub.f32 %v2536_v38, %v3007_v12  ;;  %v3009_v23 = vand.u32 4294901760, %v2609_v5  ;;  %v3012_v38 = vand.u32 4294901760, %v2630_v17 }
  0x3a   : > { %v2753_v39 = vsub.f32 %v2519_v34, %v3006_v58  ;;  %1692 = vmatprep.mubr.f32.mxu1 %v296_v8  ;;  %1833 = vmatprep.mubr.f32.mxu0 %v3010_v59  ;;  %v335_v34 = vsub.f32 %v2692_v24, %v3011_v45  ;;  %v354_v58 = vand.u32 4294901760, %v2729_v26  ;;  %v345_v12 = vsub.f32 %v2702_v46, %v344_v19 }
  0x3b   : > { %v2079_v32 = vpack.c.bf16 %v424_v57, %v3009_v23  ;;  %1693 = vmatmul.mubr.f32.gmra.mrb[2].mxu1 %v306_v28  ;;  %1834 = vmatmul.mubr.f32.gmra.mrb[2].mxu0 %v3012_v38  ;;  %v364_v57 = vand.u32 4294901760, %v2761_v0  ;;  %v433_v59 = vand.u32 4294901760, %v432_v4  ;;  %v440_v8 = vand.u32 4294901760, %v439_v31 }
  0x3c   : > { %1978 = vmatpush3.bf16.msra.mxu1 %v2668_v50  ;;  %2074 = vmatpush3.bf16.msra.mxu0 %v2653_v61  ;;  %v446_v45 = vsub.f32 %v2712_v20, %v445_v9  ;;  %v459_v28 = vand.u32 4294901760, %v2753_v39  ;;  %v466_v60 = vand.u32 4294901760, %v2758_v3  ;;  %v3014_v50 = vand.u32 4294901760, %v2551_v44 }
  0x3d   : > { %1980 = vmatprep.subr.bf16.mxu1 %v1979_v52  ;;  %2076 = vmatprep.subr.bf16.mxu0 %v2075_v18  ;;  %v3015_v4 = vand.u32 4294901760, %v2656_v1  ;;  %v336_v31 = vand.u32 4294901760, %v335_v34  ;;  %v355_v23 = vsub.f32 %v2729_v26, %v354_v58  ;;  %v3016_v38 = vand.u32 4294901760, %v2663_v42 }
  0x3e   : > { %v2789_v61 = vsub.f32 %v2551_v44, %v3014_v50  ;;  %1695 = vmatprep.mubr.f32.mxu1 %v316_v48  ;;  %v346_v46 = vand.u32 4294901760, %v345_v12  ;;  %v365_v43 = vsub.f32 %v2761_v0, %v364_v57  ;;  %v1987_v21 = vpack.c.bf16 %v440_v8, %v433_v59 }
  0x3f   : > { %1836 = vmatprep.mubr.f32.mxu0 %v3015_v4  ;;  %1696 = vmatmul.mubr.f32.gmra.mrb[4].mxu1 %v326_v47  ;;  %v3017_v44 = vand.u32 4294901760, %v2673_v51  ;;  %v3018_v48 = vand.u32 4294901760, %v2678_v63  ;;  %v447_v1 = vand.u32 4294901760, %v446_v45  ;;  %v454_v4 = vand.u32 4294901760, %v453_v25 }
  0x40   : > { %1837 = vmatmul.mubr.f32.gmra.mrb[4].mxu0 %v3016_v38  ;;  %1982 = vmatpush3.bf16.msra.mxu1 %v1979_v52  ;;  %v460_v34 = vsub.f32 %v2753_v39, %v459_v28  ;;  %v467_v47 = vsub.f32 %v2758_v3, %v466_v60  ;;  %v473_v12 = vand.u32 4294901760, %v2784_v41  ;;  %v480_v38 = vand.u32 4294901760, %v2789_v61 }
  0x41   : > { %2078 = vmatpush3.bf16.msra.mxu0 %v2075_v18  ;;  %v2083_v50 = vpack.c.bf16 %v3018_v48, %v3017_v44  ;;  %1984 = vmatprep.subr.bf16.mxu1 %v1983_v37  ;;  %v3019_v18 = vand.u32 4294901760, %v2692_v24  ;;  %v356_v52 = vand.u32 4294901760, %v355_v23  ;;  %v366_v59 = vand.u32 4294901760, %v365_v43 }
  0x42   : > { %2080 = vmatprep.subr.bf16.mxu0 %v2079_v32  ;;  %1698 = vmatprep.mubr.f32.mxu1 %v336_v31  ;;  %v1991_v8 = vpack.c.bf16 %v454_v4, %v447_v1  ;;  %v2087_v45 = vpack.c.bf16 %v452_v15, %v445_v9  ;;  %v461_v25 = vand.u32 4294901760, %v460_v34  ;;  %v468_v44 = vand.u32 4294901760, %v467_v47 }
  0x43   : > { %1839 = vmatprep.mubr.f32.mxu0 %v3019_v18  ;;  %1699 = vmatmul.mubr.f32.gmra.mrb[6].mxu1 %v346_v46  ;;  %v474_v48 = vsub.f32 %v2784_v41, %v473_v12  ;;  %v481_v0 = vsub.f32 %v2789_v61, %v480_v38  ;;  %v2091_v46 = vpack.c.bf16 %v466_v60, %v459_v28 }
  0x44   : > { %1840 = vmatmul.mubr.f32.gmra.mrb[6].mxu0 %v344_v19  ;;  %1986 = vmatpush3.bf16.msra.mxu1 %v1983_v37  ;;  %v1995_v37 = vpack.c.bf16 %v468_v44, %v461_v25  ;;  %v2095_v9 = vpack.c.bf16 %v480_v38, %v473_v12  ;;  %v2003_v15 = vpack.c.bf16 %v2509_v30, %v2507_v29  ;;  %v3020_v30 = vld [vmem:[#allocation4_spill] sm:$0xff] }
  0x45   : > { %2082 = vmatpush3.bf16.msra.mxu0 %v2079_v32  ;;  %1988 = vmatprep.subr.bf16.mxu1 %v1987_v21  ;;  %v475_v1 = vand.u32 4294901760, %v474_v48  ;;  %v482_v32 = vand.u32 4294901760, %v481_v0  ;;  %v2007_v0 = vpack.c.bf16 %v2523_v36, %v2521_v35  ;;  %v2011_v29 = vpack.c.bf16 %v2578_v55, %v2573_v54  ;;  %v3021_v35 = vld [vmem:[#allocation10_spill] sm:$0xff]  ;;  %v3022_v36 = vld [vmem:[#allocation5_spill] sm:$0xff]  ;;  %v3023_v54 = vld [vmem:[#allocation3_spill] sm:$0xff] }
  0x46   : > { %2084 = vmatprep.subr.bf16.mxu0 %v2083_v50  ;;  %1701 = vmatprep.mubr.f32.mxu1 %v356_v52  ;;  %v2031_v55 = vpack.c.bf16 %v2789_v61, %v2784_v41 }
  0x47   : > { %1842 = vmatprep.mubr.f32.mxu0 %v354_v58  ;;  %1702 = vmatmul.mubr.f32.gmra.mrb[8].mxu1 %v366_v59  ;;  %v1999_v19 = vpack.c.bf16 %v482_v32, %v475_v1 }
  0x48   : > { %1843 = vmatmul.mubr.f32.gmra.mrb[8].mxu0 %v364_v57  ;;  %1990 = vmatpush3.bf16.msra.mxu1 %v1987_v21 }
  0x49   : > { %2086 = vmatpush3.bf16.msra.mxu0 %v2083_v50  ;;  %1992 = vmatprep.subr.bf16.mxu1 %v1991_v8 }
  0x4a   : > { %2088 = vmatprep.subr.bf16.mxu0 %v2087_v45  ;;  %1736 = vmatprep.mubr.f32.mxu1 %v2502_v27 }
  0x4b   : > { %1877 = vmatprep.mubr.f32.mxu0 %v2502_v27 }
  0x4c   : > { %1994 = vmatpush3.bf16.msra.mxu1 %v1991_v8 }
  0x4d   : > { %2090 = vmatpush3.bf16.msra.mxu0 %v2087_v45  ;;  %1996 = vmatprep.subr.bf16.mxu1 %v1995_v37 }
  0x4e   : > { %2092 = vmatprep.subr.bf16.mxu0 %v2091_v46 }
  0x50   : > { %1998 = vmatpush3.bf16.msra.mxu1 %v1995_v37 }
  0x51   : > { %2094 = vmatpush3.bf16.msra.mxu0 %v2091_v46  ;;  %2000 = vmatprep.subr.bf16.mxu1 %v1999_v19 }
  0x52   : > { %2096 = vmatprep.subr.bf16.mxu0 %v2095_v9 }
  0x54   : > { %2002 = vmatpush3.bf16.msra.mxu1 %v1999_v19 }
  0x55   : > { %2098 = vmatpush3.bf16.msra.mxu0 %v2095_v9  ;;  %2004 = vmatprep.subr.bf16.mxu1 %v2003_v15 }
  0x56   : > { %2100 = vmatprep.subr.bf16.mxu0 %v2432_v10 }
  0x57   : > { %1737 = vmatmul.mubr.f32.vlgmr.msra.gmra.mrb[0].mxu1 %v2539_v40 }
  0x58   : > { %1878 = vmatmul.mubr.f32.vlgmr.msra.gmra.mrb[0].mxu0 %v2539_v40  ;;  %2006 = vmatpush3.bf16.msra.mxu1 %v2003_v15 }
  0x59   : > { %2102 = vmatpush3.bf16.msra.mxu0 %v2432_v10  ;;  %2008 = vmatprep.subr.bf16.mxu1 %v2007_v0  ;;  %v2015_v10 = vpack.c.bf16 %v2627_v14, %v2609_v5  ;;  %v3025_v5 = vld [vmem:[#allocation8_spill] sm:$0xff]  ;;  %v3026_v14 = vld [vmem:[#allocation6_spill] sm:$0xff] }
  0x5a   : > { %2104 = vmatprep.subr.bf16.mxu0 %v2436_v13  ;;  %1739 = vmatprep.mubr.f32.mxu1 %v2580_v56 }
  0x5b   : > { %1880 = vmatprep.mubr.f32.mxu0 %v2580_v56  ;;  %1740 = vmatmul.mubr.f32.gmra.mrb[2].mxu1 %v2589_v62 }
  0x5c   : > { %1881 = vmatmul.mubr.f32.gmra.mrb[2].mxu0 %v2589_v62  ;;  %2010 = vmatpush3.bf16.msra.mxu1 %v2007_v0 }
  0x5d   : > { %2106 = vmatpush3.bf16.msra.mxu0 %v2436_v13  ;;  %2012 = vmatprep.subr.bf16.mxu1 %v2011_v29  ;;  %v2019_v13 = vpack.c.bf16 %v2678_v63, %v2673_v51 }
  0x5e   : > { %2108 = vmatprep.subr.bf16.mxu0 %v2460_v16  ;;  %1742 = vmatprep.mubr.f32.mxu1 %v2622_v11 }
  0x5f   : > { %1883 = vmatprep.mubr.f32.mxu0 %v2622_v11  ;;  %1743 = vmatmul.mubr.f32.gmra.mrb[4].mxu1 %v2637_v53 }
  0x60   : > { %1884 = vmatmul.mubr.f32.gmra.mrb[4].mxu0 %v2637_v53  ;;  %2014 = vmatpush3.bf16.msra.mxu1 %v2011_v29 }
  0x61   : > { %2110 = vmatpush3.bf16.msra.mxu0 %v2460_v16  ;;  %2016 = vmatprep.subr.bf16.mxu1 %v2015_v10  ;;  %v2023_v16 = vpack.c.bf16 %v2717_v49, %v2712_v20  ;;  %v3024_v49 = vld [vmem:[#allocation7_spill] sm:$0xff] }
  0x62   : > { %2112 = vmatprep.subr.bf16.mxu0 %v2488_v22  ;;  %1745 = vmatprep.mubr.f32.mxu1 %v2658_v2 }
  0x63   : > { %1886 = vmatprep.mubr.f32.mxu0 %v2658_v2  ;;  %1746 = vmatmul.mubr.f32.gmra.mrb[6].mxu1 %v2680_v7 }
  0x64   : > { %1887 = vmatmul.mubr.f32.gmra.mrb[6].mxu0 %v2680_v7  ;;  %2018 = vmatpush3.bf16.msra.mxu1 %v2015_v10 }
  0x65   : > { %2114 = vmatpush3.bf16.msra.mxu0 %v2488_v22  ;;  %2020 = vmatprep.subr.bf16.mxu1 %v2019_v13  ;;  %v2027_v22 = vpack.c.bf16 %v2758_v3, %v2753_v39 }
  0x66   : > { %2116 = vmatprep.subr.bf16.mxu0 %v3020_v30  ;;  %1748 = vmatprep.mubr.f32.mxu1 %v3021_v35 }
  0x67   : > { %1889 = vmatprep.mubr.f32.mxu0 %v3021_v35  ;;  %1749 = vmatmul.mubr.f32.gmra.mrb[8].mxu1 %v2731_v33 }
  0x68   : > { %1890 = vmatmul.mubr.f32.gmra.mrb[8].mxu0 %v2731_v33  ;;  %2022 = vmatpush3.bf16.msra.mxu1 %v2019_v13 }
  0x69   : > { %2118 = vmatpush3.bf16.msra.mxu0 %v3020_v30  ;;  %2024 = vmatprep.subr.bf16.mxu1 %v2023_v16 }
  0x6a   : > { %2120 = vmatprep.subr.bf16.mxu0 %v3022_v36  ;;  %1783 = vmatprep.mubr.f32.mxu1 %v3023_v54 }
  0x6b   : > { %1924 = vmatprep.mubr.f32.mxu0 %v2502_v27  ;;  %v3027_v27 = vld [vmem:[#allocation9_spill] sm:$0xff] }
  0x6c   : > { %2026 = vmatpush3.bf16.msra.mxu1 %v2023_v16 }
  0x6d   : > { %2122 = vmatpush3.bf16.msra.mxu0 %v3022_v36  ;;  %2028 = vmatprep.subr.bf16.mxu1 %v2027_v22 }
  0x6e   : > { %2124 = vmatprep.subr.bf16.mxu0 %v3024_v49 }
  0x70   : > { %2030 = vmatpush3.bf16.msra.mxu1 %v2027_v22 }
  0x71   : > { %2126 = vmatpush3.bf16.msra.mxu0 %v3024_v49  ;;  %2032 = vmatprep.subr.bf16.mxu1 %v2031_v55 }
  0x72   : > { %2128 = vmatprep.subr.bf16.mxu0 %v3025_v5 }
  0x74   : > { %2034 = vmatpush3.bf16.msra.mxu1 %v2031_v55 }
  0x75   : > { %2130 = vmatpush3.bf16.msra.mxu0 %v3025_v5 }
  0x77   : > { %1784 = vmatmul.mubr.f32.vlgmr.msra.gmra.mrb[0].mxu1 %v3026_v14 }
  0x78   : > { %1925 = vmatmul.mubr.f32.vlgmr.msra.gmra.mrb[0].mxu0 %v2539_v40  ;;  %1786 = vmatprep.mubr.f32.mxu1 %v2612_v6  ;;  %v3028_v40 = vld [vmem:[#allocation11_spill] sm:$0xff] }
  0x79   : > { %1927 = vmatprep.mubr.f32.mxu0 %v2580_v56  ;;  %v3029_v56 = vld [vmem:[#allocation12_spill] sm:$0xff] }
  0x7b   : > { %1787 = vmatmul.mubr.f32.gmra.mrb[2].mxu1 %v2630_v17 }
  0x7c   : > { %1928 = vmatmul.mubr.f32.gmra.mrb[2].mxu0 %v2589_v62  ;;  %1789 = vmatprep.mubr.f32.mxu1 %v3027_v27 }
  0x7d   : > { %1930 = vmatprep.mubr.f32.mxu0 %v2622_v11 }
  0x7f   : > { %1790 = vmatmul.mubr.f32.gmra.mrb[4].mxu1 %v2663_v42 }
  0x80   : > { %1931 = vmatmul.mubr.f32.gmra.mrb[4].mxu0 %v2637_v53  ;;  %1792 = vmatprep.mubr.f32.mxu1 %v2692_v24 }
  0x81   : > { %1933 = vmatprep.mubr.f32.mxu0 %v2658_v2 }
  0x83   : > { %1793 = vmatmul.mubr.f32.gmra.mrb[6].mxu1 %v3028_v40 }
  0x84   : > { %1934 = vmatmul.mubr.f32.gmra.mrb[6].mxu0 %v2680_v7  ;;  %1795 = vmatprep.mubr.f32.mxu1 %v2729_v26 }
  0x85   : > { %1936 = vmatprep.mubr.f32.mxu0 %v3021_v35 }
  0x87   : > { %1796 = vmatmul.mubr.f32.gmra.mrb[8].mxu1 %v3029_v56 }
  0x88   : > { %1937 = vmatmul.mubr.f32.gmra.mrb[8].mxu0 %v2731_v33 }
 0x14a   : > { %v1785_v42 = vpop.f32.mrb[0].mxu1 }
 0x14b   : > { %v1926_v62 = vpop.f32.mrb[0].mxu0  ;;  %v677_v11 = vpop.f32.mrb[1].mxu1 }
 0x14c   : > { %v2131_v6 = vadd.f32 %v1926_v62, %v1785_v42  ;;  %v1161_v17 = vpop.f32.mrb[1].mxu0 }
 0x14d   : > { %v2132_v53 = vadd.f32 %v1161_v17, %v677_v11 }
 0x14e   : > { %1221 = vst.msk [vmem:[%s2882_s11 + $0x8] sm:$0xff] %vm1219_vm0, %v2131_v6  ;;  %v1788_v2 = vpop.f32.mrb[2].mxu1 }
 0x14f   : > { %1220 = vst.msk [vmem:[%s2882_s11] sm:$0xff] %vm1219_vm0, %v2132_v53  ;;  %v1929_v51 = vpop.f32.mrb[2].mxu0  ;;  %v691_v7 = vpop.f32.mrb[3].mxu1 }
 0x150   : > { %v2133_v63 = vadd.f32 %v1929_v51, %v1788_v2  ;;  %v1173_v20 = vpop.f32.mrb[3].mxu0 }
 0x151   : > { %v2134_v24 = vadd.f32 %v1173_v20, %v691_v7 }
 0x152   : > { %1223 = vst.msk [vmem:[%s2882_s11 + $0x18] sm:$0xff] %vm1219_vm0, %v2133_v63  ;;  %v1791_v26 = vpop.f32.mrb[4].mxu1 }
 0x153   : > { %1222 = vst.msk [vmem:[%s2882_s11 + $0x10] sm:$0xff] %vm1219_vm0, %v2134_v24  ;;  %v1932_v33 = vpop.f32.mrb[4].mxu0  ;;  %v705_v3 = vpop.f32.mrb[5].mxu1 }
 0x154   : > { %v2135_v39 = vadd.f32 %v1932_v33, %v1791_v26  ;;  %v1185_v58 = vpop.f32.mrb[5].mxu0 }
 0x155   : > { %v2136_v57 = vadd.f32 %v1185_v58, %v705_v3 }
 0x156   : > { %1225 = vst.msk [vmem:[%s2882_s11 + $0x28] sm:$0xff] %vm1219_vm0, %v2135_v39  ;;  %v1794_v28 = vpop.f32.mrb[6].mxu1 }
 0x157   : > { %1224 = vst.msk [vmem:[%s2882_s11 + $0x20] sm:$0xff] %vm1219_vm0, %v2136_v57  ;;  %v1935_v60 = vpop.f32.mrb[6].mxu0  ;;  %v719_v61 = vpop.f32.mrb[7].mxu1 }
 0x158   : > { %v2137_v41 = vadd.f32 %v1935_v60, %v1794_v28  ;;  %v1197_v31 = vpop.f32.mrb[7].mxu0 }
 0x159   : > { %v2138_v23 = vadd.f32 %v1197_v31, %v719_v61  ;;  %1236 = sbr.rel (!%p2403_p4) target bundleno = 413 (0x19d), region = 32 }
 0x15a   : > { %1227 = vst.msk [vmem:[%s2882_s11 + $0x38] sm:$0xff] %vm1219_vm0, %v2137_v41  ;;  %v1797_v43 = vpop.f32.mrb[8].mxu1 }
 0x15b   : > { %1226 = vst.msk [vmem:[%s2882_s11 + $0x30] sm:$0xff] %vm1219_vm0, %v2138_v23  ;;  %v1938_v21 = vpop.f32.mrb[8].mxu0  ;;  %v733_v4 = vpop.f32.mrb[9].mxu1 }
 0x15c   : > { %v2139_v50 = vadd.f32 %v1938_v21, %v1797_v43  ;;  %v1209_v34 = vpop.f32.mrb[9].mxu0 }
 0x15d   : > { %v2140_v47 = vadd.f32 %v1209_v34, %v733_v4 }
 0x15e   : > { %1229 = vst.msk [vmem:[%s2882_s11 + $0x48] sm:$0xff] %vm1219_vm0, %v2139_v50 }
 0x15f   : > { %1228 = vst.msk [vmem:[%s2882_s11 + $0x40] sm:$0xff] %vm1219_vm0, %v2140_v47 }
 0x160   : > { %s3037_s9 = smov (!%p1239_p8, %s1238_s9), 10 }
 0x161   : > { %s1488_s20 = sshll.u32 %s3037_s9, 7 }
 0x162   : > { %p1491_p9 = scmp.eq.s32.totalorder %s1488_s20, 0 }
 0x163   : > { %2271 = sdivrem.u32 (!%p1491_p9), %s3037_s9, 10 }
 0x164   : > { %1247 = sbr.rel (%p1491_p9) target bundleno = 413 (0x19d), region = 36 }
 0x16c   : > { %s2917_s17 = spop.drf %2271 }
 0x16d   : > { %p1492_p10 = scmp.le.s32.totalorder %s2917_s17, 0 }
 0x16e   : > { %s3030_s12 = smov (!%p1492_p10), %s2911_s19  ;;  %s3031_s24 = smov (!%p1492_p10), %s2882_s11 }
 0x16f   : > { %1439 = sbr.rel (%p1492_p10) target bundleno = 384 (0x180), region = 112  ;;  %s2926_s21 = smov (!%p1492_p10), 0  }
 0x170   : > { %s2928_s22 = smov (!%p1492_p10), 0  }
 0x176 LB: >> { %v1329_v12 = vld [vmem:[%s2337_s24] sm:$0xff]  ;;  %v1331_v38 = vld [vmem:[%s2337_s24 + $0x8] sm:$0xff]  ;;  %v1333_v18 = vld [vmem:[%s2337_s24 + $0x10] sm:$0xff]  ;;  %s1349_s23 = sadd.s32 1, %s2341_s21  ;;  %s1323_s22 = sadd.s32 1, %s2345_s22   ;;  %s2345_s22 = sphi %s2928_s22, %s1323_s22   ;;  %s2341_s21 = sphi %s2926_s21, %s3032_s21   ;;  %s2337_s24 = sphi %s3031_s24, %s1354_s24   ;;  %s2333_s12 = sphi %s3030_s12, %s1355_s12  }
 0x177   : >> { %1330 = vst [vmem:[%s2333_s12] sm:$0xff] %v1329_v12  ;;  %1332 = vst [vmem:[%s2333_s12 + $0x8] sm:$0xff] %v1331_v38  ;;  %v1335_v52 = vld [vmem:[%s2337_s24 + $0x18] sm:$0xff]  ;;  %v1337_v59 = vld [vmem:[%s2337_s24 + $0x20] sm:$0xff]  ;;  %p1350_p11 = scmp.ge.s32.totalorder %s1349_s23, %s2917_s17  ;;  %p1322_p12 = scmp.ge.s32.totalorder %s1323_s22, %s2917_s17 }
 0x178   : >> { %1334 = vst [vmem:[%s2333_s12 + $0x10] sm:$0xff] %v1333_v18  ;;  %v1339_v8 = vld [vmem:[%s2337_s24 + $0x28] sm:$0xff]  ;;  %1336 = vst [vmem:[%s2333_s12 + $0x18] sm:$0xff] %v1335_v52  ;;  %v1341_v45 = vld [vmem:[%s2337_s24 + $0x30] sm:$0xff] }
 0x179   : >> { %1338 = vst [vmem:[%s2333_s12 + $0x20] sm:$0xff] %v1337_v59  ;;  %1340 = vst [vmem:[%s2333_s12 + $0x28] sm:$0xff] %v1339_v8  ;;  %v1343_v25 = vld [vmem:[%s2337_s24 + $0x38] sm:$0xff]  ;;  %v1345_v44 = vld [vmem:[%s2337_s24 + $0x40] sm:$0xff]  ;;  %s3039_s23 = smov (%p1350_p11, %s1349_s23), 0  ;;  %1325 = sbr.rel (!%p1322_p12) target bundleno = 374 (0x176), region = 118 }
 0x17a   : >> { %1342 = vst [vmem:[%s2333_s12 + $0x30] sm:$0xff] %v1341_v45  ;;  %1344 = vst [vmem:[%s2333_s12 + $0x38] sm:$0xff] %v1343_v25  ;;  %v1347_v48 = vld [vmem:[%s2337_s24 + $0x48] sm:$0xff]  ;;  %s1352_s25 = smul.u32 80, %s3039_s23  ;;  %s3032_s21 = smov %s3039_s23 }
 0x17b   : >> { %1346 = vst [vmem:[%s2333_s12 + $0x40] sm:$0xff] %v1345_v44  ;;  %1348 = vst [vmem:[%s2333_s12 + $0x48] sm:$0xff] %v1347_v48 }
 0x17c   : >> { %s1354_s24 = scalar_lea.vmem %s2882_s11, %s1352_s25 [#allocation2]   ;;  %s1355_s12 = scalar_lea.vmem %s2911_s19, %s1352_s25  }
 0x180 PF: > { %2273 = sdivrem.u32 %s3037_s9, 10 }
 0x181   : > { %s1493_s26 = smul.u32 80, %s2917_s17 }
 0x183   : > { %s1360_s27 = scalar_lea.vmem %s2882_s11, %s1493_s26 [#allocation2]   ;;  %s1362_s28 = scalar_lea.vmem %s2911_s19, %s1493_s26  }
 0x189   : > { %s2274_s29 = spop.drf %2273 }
 0x18a   : > { %p1495_p13 = scmp.le.s32.totalorder %s2274_s29, 0 }
 0x18b   : > { %s2347_s30 = smov (!%p1495_p13), %s1362_s28   ;;  %s2351_s3 = smov (!%p1495_p13), %s1360_s27  }
 0x18c   : > { %1453 = sbr.rel (%p1495_p13) target bundleno = 413 (0x19d), region = 123  ;;  %s2355_s4 = smov (!%p1495_p13), 0  }
 0x18d   : > { %s2359_s5 = smov (!%p1495_p13), 0  }
 0x193 LB: >> { %v1372_v37 = vld [vmem:[%s2353_s3] sm:$0xff]  ;;  %s1374_s6 = sadd.s32 1, %s2357_s4  ;;  %s1366_s5 = sadd.s32 1, %s2361_s5   ;;  %s2361_s5 = sphi %s2359_s5, %s1366_s5   ;;  %s2357_s4 = sphi %s2355_s4, %s2356_s4   ;;  %s2353_s3 = sphi %s2351_s3, %s1379_s3   ;;  %s2349_s30 = sphi %s2347_s30, %s1380_s30  }
 0x194   : >> { %1373 = vst [vmem:[%s2349_s30] sm:$0xff] %v1372_v37  ;;  %p1375_p0 = scmp.ge.s32.totalorder %s1374_s6, %s2274_s29  ;;  %p1365_p1 = scmp.ge.s32.totalorder %s1366_s5, %s2274_s29 }
 0x196   : >> { %s3041_s6 = smov (%p1375_p0, %s1374_s6), 0  ;;  %1368 = sbr.rel (!%p1365_p1) target bundleno = 403 (0x193), region = 129 }
 0x197   : >> { %s1496_s7 = sshll.u32 %s3041_s6, 3  ;;  %s2356_s4 = smov %s3041_s6  }
 0x198   : >> { %s1379_s3 = scalar_lea.vmem %s1360_s27, %s1496_s7 [#allocation2]   ;;  %s1380_s30 = scalar_lea.vmem %s1362_s28, %s1496_s7  }
 0x19d PF: > { %p9_p2 = scmp.ge.s32.totalorder %s2393_s13, 4   ;;  %s3033_s9 = smov %s2325_s10 }
 0x19e   : > { %s3034_s10 = smov %s2401_s16  ;;  %s3035_s11 = smov %s2393_s13 }
 0x19f   :  { %11 = sbr.rel (!%p9_p2) target bundleno = 2 (0x2), region = 140 }

</bundles_post_ra>
